<compile_context>
chip_gen: v6e
topology: v6e:2x2x1
jax: 0.10.0
libtpu: 0.0.40
codegen_flags: <defaults>
</compile_context>

<pallas_src>
import functools

import jax
import jax.numpy as jnp
import numpy as np
from jax.experimental import pallas as pl
from jax.experimental.pallas import tpu as pltpu


def _round_up(x, m):
    return (x + m - 1) // m * m


# ----------------------------------------------------------------------------
# Fused kernel: per-tap conv matmuls -> (bias + position mask) -> ReLU ->
#               max-pool over positions -> optional fused projection
# ----------------------------------------------------------------------------
def _cnn_encoder_kernel(x_ref, w_ref, bp_ref, *rest, k_max, t_out_p,
                        has_projection):
    # x_ref : (Bt, T_pad, D)    pre-masked tokens (matmul dtype, zero padded)
    # w_ref : (k_max, D, FP)    per-tap stacked conv weights (FP 128-padded)
    # bp_ref: (t_out_p, FP)     f32 bias where position valid, -1e30 otherwise
    # pw_ref: (FP, OP)          projection weight (only if has_projection)
    # pb_ref: (1, OP)           projection bias   (only if has_projection)
    # o_ref : (Bt, OP)          lane-dense f32 output slab
    if has_projection:
        pw_ref, pb_ref, o_ref = rest
    else:
        (o_ref,) = rest

    Bt = x_ref.shape[0]
    D = x_ref.shape[2]
    FP = w_ref.shape[2]

    # Stacked ngram conv as k_max shifted-tap matmuls accumulated in f32.
    # No im2col concat: each tap is a (Bt*t_out_p, D) x (D, FP) MXU pass.
    acc = jnp.dot(x_ref[:, 0:t_out_p, :].reshape(Bt * t_out_p, D), w_ref[0],
                  preferred_element_type=jnp.float32)
    for j in range(1, k_max):
        xj = x_ref[:, j:j + t_out_p, :].reshape(Bt * t_out_p, D)
        acc = acc + jnp.dot(xj, w_ref[j], preferred_element_type=jnp.float32)

    # Combined bias + position-validity table, ReLU, max over conv positions.
    acc = jnp.maximum(acc.reshape(Bt, t_out_p, FP) + bp_ref[...][None, :, :],
                      0.0)
    pooled = jnp.max(acc, axis=1)                                # (Bt, FP) f32

    if has_projection:
        out = jnp.dot(pooled.astype(pw_ref.dtype), pw_ref[...],
                      preferred_element_type=jnp.float32) + pb_ref[...]
        o_ref[...] = out.astype(o_ref.dtype)
    else:
        o_ref[...] = pooled.astype(o_ref.dtype)


# ----------------------------------------------------------------------------
# One-time parameter packing (setup time, not per forward call)
# ----------------------------------------------------------------------------
def prepare_cnn_encoder_params(conv_params, proj_params, input_dim, seq_len,
                               matmul_dtype=jnp.float32):
    """conv_params: list of (w (F,D,k), b (F,), k). proj_params: (W (O,M), b (O,)) or None.

    matmul_dtype=jnp.bfloat16 is the fast path on v6e/v7x (f32 accumulate)."""
    D, T = input_dim, seq_len
    ksizes = [k for (_, _, k) in conv_params]
    F = int(np.asarray(conv_params[0][0]).shape[0])
    n = len(conv_params)
    k_max, k_min = max(ksizes), min(ksizes)
    assert T >= k_max, f"seq_len {T} must be >= max ngram size {k_max}"

    F_total = F * n
    FP = _round_up(F_total, 128)            # lane-dense filter channels
    t_out = T - k_min + 1                   # most conv positions over all sizes
    t_out_p = _round_up(t_out, 8)           # 8-aligned window count
    T_pad = _round_up(t_out_p + k_max - 1, 8)

    NEG = -1e30
    W = np.zeros((k_max, D, FP), np.float32)
    bp = np.zeros((t_out_p, FP), np.float32)
    for i, (w, b, k) in enumerate(conv_params):
        w = np.asarray(w, np.float32)                    # PyTorch Conv1d (F, D, k)
        b = np.asarray(b, np.float32)
        c0, c1 = i * F, (i + 1) * F
        for j in range(k):
            W[j, :, c0:c1] = w[:, :, j].T                # tap j weights (D, F)
        n_valid = T - k + 1                              # "valid" conv positions
        bp[:n_valid, c0:c1] = b[None, :]
        bp[n_valid:, c0:c1] = NEG                        # ReLU -> 0 at these rows

    out = dict(
        W=jnp.asarray(W, matmul_dtype), bp=jnp.asarray(bp),
        k_max=k_max, t_out_p=t_out_p, T_pad=T_pad, T=T, D=D, FP=FP,
    )
    if proj_params is not None:
        pw, pb = proj_params
        pw = np.asarray(pw, np.float32)
        pb = np.asarray(pb, np.float32)
        O = pw.shape[0]
        OP = _round_up(O, 128)
        PW = np.zeros((FP, OP), np.float32)
        PW[:F_total, :O] = pw.T
        PB = np.zeros((1, OP), np.float32)
        PB[0, :O] = pb
        out.update(PW=jnp.asarray(PW, matmul_dtype), PB=jnp.asarray(PB),
                   OP=OP, out_cols=O, has_projection=True)
    else:
        out.update(OP=FP, out_cols=F_total, has_projection=False)
    return out


# ----------------------------------------------------------------------------
# VMEM budgeting
# ----------------------------------------------------------------------------
def _vmem_capacity_bytes():
    try:
        return int(pltpu.get_tpu_info().vmem_capacity_bytes)
    except Exception:
        return 64 * 1024 * 1024     # conservative: v7x per-TensorCore VMEM


def _choose_batch_tile(B, T_pad, t_out_p, D, FP, OP, in_bytes, block_budget):
    d_pad = _round_up(D, 128)                        # VMEM lane padding
    per_row = (T_pad * d_pad * in_bytes * 2          # token block, double-buffered
               + t_out_p * FP * 4                    # f32 conv accumulator slab
               + t_out_p * FP * 4                    # relu'd slab before max-pool
               + t_out_p * d_pad * max(in_bytes, 4)  # one live shifted-tap slice
               + OP * 4 * 2)                         # output block, double-buffered
    bt = int(block_budget // max(per_row, 1))
    bt = max(8, (bt // 8) * 8)
    # Keep >= 2 grid steps when the batch allows it, so a 2-TensorCore chip
    # (v7x) can shard the 'parallel' axis across both cores.
    if B >= 16:
        bt = min(bt, _round_up(pl.cdiv(_round_up(B, 8), 2), 8))
    return bt


# ----------------------------------------------------------------------------
# Forward pass
# ----------------------------------------------------------------------------
def cnn_encoder_forward(tokens, mask, packed):
    """tokens (B,T,D), mask (B,T) -> (B, out_dim)."""
    B, T, D = tokens.shape
    assert T == packed["T"] and D == packed["D"]
    T_pad, FP, OP = packed["T_pad"], packed["FP"], packed["OP"]
    k_max, t_out_p = packed["k_max"], packed["t_out_p"]
    has_projection = packed["has_projection"]
    in_dtype = packed["W"].dtype
    in_bytes = jnp.dtype(in_dtype).itemsize

    vmem_cap = _vmem_capacity_bytes()
    vmem_limit = min(vmem_cap // 2, 96 * 1024 * 1024)
    block_budget = vmem_limit // 2

    Bt = _choose_batch_tile(B, T_pad, t_out_p, D, FP, OP, in_bytes,
                            block_budget)
    Bt = min(Bt, _round_up(B, 8))
    B_pad = _round_up(B, Bt)

    # Mask fold + dtype cast + padding fuse into one XLA op outside the kernel;
    # the kernel never sees a mask operand.
    x = (tokens.astype(jnp.float32)
         * mask.astype(jnp.float32)[..., None]).astype(in_dtype)
    x = jnp.pad(x, ((0, B_pad - B), (0, T_pad - T), (0, 0)))

    kernel = functools.partial(_cnn_encoder_kernel, k_max=k_max,
                               t_out_p=t_out_p, has_projection=has_projection)

    in_specs = [
        pl.BlockSpec((Bt, T_pad, D), lambda b: (b, 0, 0)),
        pl.BlockSpec((k_max, D, FP), lambda b: (0, 0, 0)),
        pl.BlockSpec((t_out_p, FP), lambda b: (0, 0)),
    ]
    args = [x, packed["W"], packed["bp"]]
    if has_projection:
        in_specs += [pl.BlockSpec((FP, OP), lambda b: (0, 0)),
                     pl.BlockSpec((1, OP), lambda b: (0, 0))]
        args += [packed["PW"], packed["PB"]]

    out = pl.pallas_call(
        kernel,
        out_shape=jax.ShapeDtypeStruct((B_pad, OP), jnp.float32),
        grid=(B_pad // Bt,),
        in_specs=in_specs,
        out_specs=pl.BlockSpec((Bt, OP), lambda b: (b, 0)),
        compiler_params=pltpu.CompilerParams(
            dimension_semantics=("parallel",),
            vmem_limit_bytes=int(vmem_limit)),
    )(*args)

    return out[:B, :packed["out_cols"]]


# ----------------------------------------------------------------------------
# Pure-JAX reference (mirrors the PyTorch forward) for a sanity check.
# ----------------------------------------------------------------------------
def cnn_encoder_reference(tokens, mask, conv_params, proj_params):
    x = tokens * mask[..., None].astype(tokens.dtype)            # (B, T, D)
    outs = []
    for (w, b, k) in conv_params:
        T = x.shape[1]
        t_out = T - k + 1
        acc = jnp.zeros((x.shape[0], t_out, w.shape[0]), jnp.float32)
        for j in range(k):
            acc = acc + jnp.einsum("btd,fd->btf", x[:, j:j + t_out, :], w[:, :, j])
        acc = jax.nn.relu(acc + b[None, None, :])
        outs.append(jnp.max(acc, axis=1))
    mp = jnp.concatenate(outs, axis=1) if len(outs) > 1 else outs[0]
    if proj_params is not None:
        pw, pb = proj_params
        mp = mp @ pw.T + pb
    return mp


if __name__ == "__main__":
    # batch=2, seq_len=8, input_dim=32, num_filters=8,
    # ngram_filter_sizes=(2,3,4,5), output_dim=16
    B, T, D = 2, 8, 32
    F = 8
    ngram_sizes = (2, 3, 4, 5)
    OUT_DIM = 16

    key = jax.random.PRNGKey(0)
    keys = jax.random.split(key, 4 + 2 * len(ngram_sizes))

    tokens = jax.random.normal(keys[0], (B, T, D), dtype=jnp.float32)
    mask = (jax.random.uniform(keys[1], (B, T)) > 0.25).astype(jnp.float32)

    conv_params = []
    for i, k in enumerate(ngram_sizes):
        w = jax.random.normal(keys[2 + 2 * i], (F, D, k), dtype=jnp.float32) * 0.1
        b = jax.random.normal(keys[3 + 2 * i], (F,), dtype=jnp.float32) * 0.1
        conv_params.append((w, b, k))

    proj_w = jax.random.normal(keys[-2], (OUT_DIM, F * len(ngram_sizes)),
                               dtype=jnp.float32) * 0.1
    proj_b = jax.random.normal(keys[-1], (OUT_DIM,), dtype=jnp.float32) * 0.1
    proj_params = (proj_w, proj_b)

    ref = jax.block_until_ready(
        cnn_encoder_reference(tokens, mask, conv_params, proj_params))

    # --- f32 matmul path (exact parity) -------------------------------------
    packed = prepare_cnn_encoder_params(conv_params, proj_params, D, T,
                                        matmul_dtype=jnp.float32)
    out = jax.block_until_ready(cnn_encoder_forward(tokens, mask, packed))
    assert out.shape == (B, OUT_DIM), out.shape
    np.testing.assert_allclose(np.asarray(out), np.asarray(ref),
                               rtol=1e-2, atol=1e-2)

    # --- bf16 operands (v6e/v7x MXU fast path), f32 accumulate --------------
    packed_bf16 = prepare_cnn_encoder_params(conv_params, proj_params, D, T,
                                             matmul_dtype=jnp.bfloat16)
    out_bf16 = jax.block_until_ready(
        cnn_encoder_forward(tokens, mask, packed_bf16))
    np.testing.assert_allclose(np.asarray(out_bf16), np.asarray(ref),
                               rtol=5e-2, atol=5e-2)

    # --- no-projection path (module with output_dim=None) -------------------
    packed_np = prepare_cnn_encoder_params(conv_params, None, D, T,
                                           matmul_dtype=jnp.float32)
    out_np = jax.block_until_ready(cnn_encoder_forward(tokens, mask, packed_np))
    ref_np = jax.block_until_ready(
        cnn_encoder_reference(tokens, mask, conv_params, None))
    assert out_np.shape == (B, F * len(ngram_sizes)), out_np.shape
    np.testing.assert_allclose(np.asarray(out_np), np.asarray(ref_np),
                               rtol=1e-2, atol=1e-2)

    print("KERNEL_OK")
</pallas_src>

<mosaic_0001>
module attributes {stable_mosaic.version = 11 : i64} {
  func.func @_cnn_encoder_kernel(%arg0: i32, %arg1: memref<8x16x32xf32, #tpu.memory_space<vmem>>, %arg2: memref<5x32x128xf32, #tpu.memory_space<vmem>>, %arg3: memref<8x128xf32, #tpu.memory_space<vmem>>, %arg4: memref<128x128xf32, #tpu.memory_space<vmem>>, %arg5: memref<1x128xf32, #tpu.memory_space<vmem>>, %arg6: memref<8x128xf32, #tpu.memory_space<vmem>>) attributes {dimension_semantics = [#tpu.dimension_semantics<parallel>], iteration_bounds = array<i64: 1>, scalar_prefetch = 0 : i64, scratch_operands = 0 : i64, tpu.core_type = #tpu.core_type<tc>, window_params = [{transform_indices = @transform_0, window_bounds = array<i64: 8, 16, 32>}, {pipeline_mode = #tpu.pipeline_mode<synchronous>, transform_indices = @transform_1, window_bounds = array<i64: 5, 32, 128>}, {pipeline_mode = #tpu.pipeline_mode<synchronous>, transform_indices = @transform_2, window_bounds = array<i64: 8, 128>}, {pipeline_mode = #tpu.pipeline_mode<synchronous>, transform_indices = @transform_3, window_bounds = array<i64: 128, 128>}, {pipeline_mode = #tpu.pipeline_mode<synchronous>, transform_indices = @transform_4, window_bounds = array<i64: 1, 128>}, {transform_indices = @transform_5, window_bounds = array<i64: 8, 128>}]} {
    %c0 = arith.constant 0 : index
    %c0_0 = arith.constant 0 : index
    %c0_1 = arith.constant 0 : index
    %0 = vector.load %arg1[%c0, %c0_0, %c0_1] : memref<8x16x32xf32, #tpu.memory_space<vmem>>, vector<8x8x32xf32>
    %1 = vector.shape_cast %0 : vector<8x8x32xf32> to vector<64x32xf32>
    %c0_2 = arith.constant 0 : index
    %c0_3 = arith.constant 0 : index
    %c0_4 = arith.constant 0 : index
    %2 = vector.load %arg2[%c0_2, %c0_3, %c0_4] : memref<5x32x128xf32, #tpu.memory_space<vmem>>, vector<1x32x128xf32>
    %3 = vector.shape_cast %2 : vector<1x32x128xf32> to vector<32x128xf32>
    %cst = arith.constant dense<0.000000e+00> : vector<64x128xf32>
    %4 = tpu.matmul %1, %3, %cst {dimension_numbers = #tpu.dot_dimension_numbers<[1], [0], [0], [1], [0, 0, 1, 1], [], []>} : vector<64x32xf32>, vector<32x128xf32>, vector<64x128xf32> -> vector<64x128xf32>
    %c0_5 = arith.constant 0 : index
    %c1 = arith.constant 1 : index
    %c0_6 = arith.constant 0 : index
    %5 = vector.load %arg1[%c0_5, %c1, %c0_6] : memref<8x16x32xf32, #tpu.memory_space<vmem>>, vector<8x8x32xf32>
    %6 = vector.shape_cast %5 : vector<8x8x32xf32> to vector<64x32xf32>
    %c1_7 = arith.constant 1 : index
    %c0_8 = arith.constant 0 : index
    %c0_9 = arith.constant 0 : index
    %7 = vector.load %arg2[%c1_7, %c0_8, %c0_9] : memref<5x32x128xf32, #tpu.memory_space<vmem>>, vector<1x32x128xf32>
    %8 = vector.shape_cast %7 : vector<1x32x128xf32> to vector<32x128xf32>
    %cst_10 = arith.constant dense<0.000000e+00> : vector<64x128xf32>
    %9 = tpu.matmul %6, %8, %cst_10 {dimension_numbers = #tpu.dot_dimension_numbers<[1], [0], [0], [1], [0, 0, 1, 1], [], []>} : vector<64x32xf32>, vector<32x128xf32>, vector<64x128xf32> -> vector<64x128xf32>
    %10 = arith.addf %4, %9 : vector<64x128xf32>
    %c0_11 = arith.constant 0 : index
    %c2 = arith.constant 2 : index
    %c0_12 = arith.constant 0 : index
    %11 = vector.load %arg1[%c0_11, %c2, %c0_12] : memref<8x16x32xf32, #tpu.memory_space<vmem>>, vector<8x8x32xf32>
    %12 = vector.shape_cast %11 : vector<8x8x32xf32> to vector<64x32xf32>
    %c2_13 = arith.constant 2 : index
    %c0_14 = arith.constant 0 : index
    %c0_15 = arith.constant 0 : index
    %13 = vector.load %arg2[%c2_13, %c0_14, %c0_15] : memref<5x32x128xf32, #tpu.memory_space<vmem>>, vector<1x32x128xf32>
    %14 = vector.shape_cast %13 : vector<1x32x128xf32> to vector<32x128xf32>
    %cst_16 = arith.constant dense<0.000000e+00> : vector<64x128xf32>
    %15 = tpu.matmul %12, %14, %cst_16 {dimension_numbers = #tpu.dot_dimension_numbers<[1], [0], [0], [1], [0, 0, 1, 1], [], []>} : vector<64x32xf32>, vector<32x128xf32>, vector<64x128xf32> -> vector<64x128xf32>
    %16 = arith.addf %10, %15 : vector<64x128xf32>
    %c0_17 = arith.constant 0 : index
    %c3 = arith.constant 3 : index
    %c0_18 = arith.constant 0 : index
    %17 = vector.load %arg1[%c0_17, %c3, %c0_18] : memref<8x16x32xf32, #tpu.memory_space<vmem>>, vector<8x8x32xf32>
    %18 = vector.shape_cast %17 : vector<8x8x32xf32> to vector<64x32xf32>
    %c3_19 = arith.constant 3 : index
    %c0_20 = arith.constant 0 : index
    %c0_21 = arith.constant 0 : index
    %19 = vector.load %arg2[%c3_19, %c0_20, %c0_21] : memref<5x32x128xf32, #tpu.memory_space<vmem>>, vector<1x32x128xf32>
    %20 = vector.shape_cast %19 : vector<1x32x128xf32> to vector<32x128xf32>
    %cst_22 = arith.constant dense<0.000000e+00> : vector<64x128xf32>
    %21 = tpu.matmul %18, %20, %cst_22 {dimension_numbers = #tpu.dot_dimension_numbers<[1], [0], [0], [1], [0, 0, 1, 1], [], []>} : vector<64x32xf32>, vector<32x128xf32>, vector<64x128xf32> -> vector<64x128xf32>
    %22 = arith.addf %16, %21 : vector<64x128xf32>
    %c0_23 = arith.constant 0 : index
    %c4 = arith.constant 4 : index
    %c0_24 = arith.constant 0 : index
    %23 = vector.load %arg1[%c0_23, %c4, %c0_24] : memref<8x16x32xf32, #tpu.memory_space<vmem>>, vector<8x8x32xf32>
    %24 = vector.shape_cast %23 : vector<8x8x32xf32> to vector<64x32xf32>
    %c4_25 = arith.constant 4 : index
    %c0_26 = arith.constant 0 : index
    %c0_27 = arith.constant 0 : index
    %25 = vector.load %arg2[%c4_25, %c0_26, %c0_27] : memref<5x32x128xf32, #tpu.memory_space<vmem>>, vector<1x32x128xf32>
    %26 = vector.shape_cast %25 : vector<1x32x128xf32> to vector<32x128xf32>
    %cst_28 = arith.constant dense<0.000000e+00> : vector<64x128xf32>
    %27 = tpu.matmul %24, %26, %cst_28 {dimension_numbers = #tpu.dot_dimension_numbers<[1], [0], [0], [1], [0, 0, 1, 1], [], []>} : vector<64x32xf32>, vector<32x128xf32>, vector<64x128xf32> -> vector<64x128xf32>
    %28 = arith.addf %22, %27 : vector<64x128xf32>
    %29 = vector.shape_cast %28 : vector<64x128xf32> to vector<8x8x128xf32>
    %c0_29 = arith.constant 0 : index
    %c0_30 = arith.constant 0 : index
    %30 = vector.load %arg3[%c0_29, %c0_30] : memref<8x128xf32, #tpu.memory_space<vmem>>, vector<8x128xf32>
    %31 = vector.shape_cast %30 : vector<8x128xf32> to vector<1x8x128xf32>
    %32 = vector.broadcast %31 : vector<1x8x128xf32> to vector<8x8x128xf32>
    %33 = arith.addf %29, %32 : vector<8x8x128xf32>
    %cst_31 = arith.constant 0.000000e+00 : f32
    %34 = vector.broadcast %cst_31 : f32 to vector<8x8x128xf32>
    %35 = arith.maximumf %33, %34 : vector<8x8x128xf32>
    %cst_32 = arith.constant dense<0xFF800000> : vector<8x128xf32>
    %36 = vector.multi_reduction <maximumf>, %35, %cst_32 [1] : vector<8x8x128xf32> to vector<8x128xf32>
    %c0_33 = arith.constant 0 : index
    %c0_34 = arith.constant 0 : index
    %37 = vector.load %arg4[%c0_33, %c0_34] : memref<128x128xf32, #tpu.memory_space<vmem>>, vector<128x128xf32>
    %cst_35 = arith.constant dense<0.000000e+00> : vector<8x128xf32>
    %38 = tpu.matmul %36, %37, %cst_35 {dimension_numbers = #tpu.dot_dimension_numbers<[1], [0], [0], [1], [0, 0, 1, 1], [], []>} : vector<8x128xf32>, vector<128x128xf32>, vector<8x128xf32> -> vector<8x128xf32>
    %c0_36 = arith.constant 0 : index
    %c0_37 = arith.constant 0 : index
    %39 = vector.load %arg5[%c0_36, %c0_37] : memref<1x128xf32, #tpu.memory_space<vmem>>, vector<1x128xf32>
    %40 = vector.broadcast %39 : vector<1x128xf32> to vector<8x128xf32>
    %41 = arith.addf %38, %40 : vector<8x128xf32>
    %c0_38 = arith.constant 0 : index
    %c0_39 = arith.constant 0 : index
    %42 = vector.load %arg6[%c0_38, %c0_39] : memref<8x128xf32, #tpu.memory_space<vmem>>, vector<8x128xf32>
    tpu.vector_store %arg6[%c0_38, %c0_39], %41 {strides = array<i32>} : memref<8x128xf32, #tpu.memory_space<vmem>>, vector<8x128xf32>,
    return
  }
  func.func @transform_0(%arg0: i32) -> (i32, i32, i32) {
    %c0_i32 = arith.constant 0 : i32
    %c0_i32_0 = arith.constant 0 : i32
    %c0_i32_1 = arith.constant 0 : i32
    return %arg0, %c0_i32, %c0_i32_0 : i32, i32, i32
  }
  func.func @transform_1(%arg0: i32) -> (i32, i32, i32) {
    %c0_i32 = arith.constant 0 : i32
    %c0_i32_0 = arith.constant 0 : i32
    %c0_i32_1 = arith.constant 0 : i32
    %c0_i32_2 = arith.constant 0 : i32
    return %c0_i32, %c0_i32_0, %c0_i32_1 : i32, i32, i32
  }
  func.func @transform_2(%arg0: i32) -> (i32, i32) {
    %c0_i32 = arith.constant 0 : i32
    %c0_i32_0 = arith.constant 0 : i32
    %c0_i32_1 = arith.constant 0 : i32
    return %c0_i32, %c0_i32_0 : i32, i32
  }
  func.func @transform_3(%arg0: i32) -> (i32, i32) {
    %c0_i32 = arith.constant 0 : i32
    %c0_i32_0 = arith.constant 0 : i32
    %c0_i32_1 = arith.constant 0 : i32
    return %c0_i32, %c0_i32_0 : i32, i32
  }
  func.func @transform_4(%arg0: i32) -> (i32, i32) {
    %c0_i32 = arith.constant 0 : i32
    %c0_i32_0 = arith.constant 0 : i32
    %c0_i32_1 = arith.constant 0 : i32
    return %c0_i32, %c0_i32_0 : i32, i32
  }
  func.func @transform_5(%arg0: i32) -> (i32, i32) {
    %c0_i32 = arith.constant 0 : i32
    %c0_i32_0 = arith.constant 0 : i32
    return %arg0, %c0_i32 : i32, i32
  }
}

</mosaic_0001>

<bundles_post_ra>
// kernel: tpu_custom_call.1
= control target key start
LH: loop header
LB: loop body
LE: loop exit
PB: predicated region body
PF: predicated region fallthrough
CT: control target
= control target key end

     0   :  { %10 = vsyncpa [#allocation3], 0  ;;  %s1493_s0 = inlined_call_operand.hbm [shape: f32[8,16,32], index: 0, kind: input, shape index: {}]   ;;  %s1494_s1 = inlined_call_operand.hbm [shape: f32[5,32,128], index: 1, kind: input, shape index: {}]   ;;  %s1495_s2 = inlined_call_operand.hbm [shape: f32[8,128], index: 2, kind: input, shape index: {}]   ;;  %s1496_s3 = inlined_call_operand.hbm [shape: f32[128,128], index: 3, kind: input, shape index: {}]   ;;  %s1497_s4 = inlined_call_operand.vmem [shape: f32[1,128], index: 4, kind: input, shape index: {}]   ;;  %s1498_s5 = inlined_call_operand.hbm [shape: f32[8,128], index: 5, kind: output, shape index: {}]  }
   0x1   :  { %11 = vsyncpa [#allocation6], 0 }
   0x2   :  { %12 = vsyncpa [#allocation9], 0 }
   0x3   :  { %13 = vsyncpa [#allocation4], 0  ;;  %s1377_s18 = smov [#allocation5]   ;;  %s1378_s20 = smov [#allocation2]  }
   0x4   :  { %s31_s19 = sshll.u32 %s1377_s18, 4  ;;  %s19_s21 = sshll.u32 %s1378_s20, 4  ;;  %s32_s19 = int_to_ptr.vmem [resolvable:$true] %s31_s19  ;;  %s20_s21 = int_to_ptr.vmem [resolvable:$true] %s19_s21 }
   0x5   :  { %s1277_s22 = scalar_lea.vmem %s32_s19, 2560  ;;  %p1282_p1 = scmp.lt.s32.totalorder %s32_s19, %s32_s19 }
   0x6   :  { %p1278_p0 = scmp.ne.s32.totalorder %s32_s19, %s1277_s22  ;;  %p1283_p2 = scmp.lt.s32.totalorder %s1277_s22, %s1277_s22 }
   0x8   :  { %p1284_p3 = por %p1283_p2, %p1282_p1 }
   0xa   :  { %p1285_p4 = pnand %p1284_p3, %p1278_p0 }
   0xc   :  { %1288 = shalt.err (!%p1285_p4)
}
   0xd   :  { %s1379_s23 = smov 128   ;;  %s1380_s24 = smov 8  }
   0xe   :  { %37 = dma.hbm_to_vmem [thread:$0]  %s1494_s1, 2560, %s32_s19, [#allocation6], %s1379_s23, %s1379_s23, %s1380_s24  }
   0xf   :  { %s1297_s27 = scalar_lea.vmem %s20_s21, 2048  ;;  %p1302_p6 = scmp.lt.s32.totalorder %s20_s21, %s20_s21 }
  0x10   :  { %p1298_p5 = scmp.ne.s32.totalorder %s20_s21, %s1297_s27  ;;  %p1303_p7 = scmp.lt.s32.totalorder %s1297_s27, %s1297_s27 }
  0x12   :  { %p1304_p8 = por %p1303_p7, %p1302_p6 }
  0x14   :  { %p1305_p9 = pnand %p1304_p8, %p1298_p5 }
  0x16   :  { %1308 = shalt.err (!%p1305_p9)
}
  0x17   :  { %25 = dma.hbm_to_vmem [thread:$0]  %s1493_s0, 2048, %s20_s21, [#allocation3], %s1379_s23, %s1379_s23, %s1380_s24  }
  0x18   :  { %s1381_s30 = smov [#allocation7]   ;;  %s1382_s7 = smov [#allocation8]  }
  0x19   :  { %s44_s6 = sshll.u32 %s1381_s30, 4  ;;  %s53_s8 = sshll.u32 %s1382_s7, 4  ;;  %s45_s6 = int_to_ptr.vmem [resolvable:$true] %s44_s6  ;;  %s54_s8 = int_to_ptr.vmem [resolvable:$true] %s53_s8 }
  0x1a   :  { %s1317_s1 = scalar_lea.vmem %s45_s6, 128  ;;  %p1322_p11 = scmp.lt.s32.totalorder %s45_s6, %s45_s6 }
  0x1b   :  { %p1318_p10 = scmp.ne.s32.totalorder %s45_s6, %s1317_s1  ;;  %p1323_p12 = scmp.lt.s32.totalorder %s1317_s1, %s1317_s1 }
  0x1d   :  { %p1324_p13 = por %p1323_p12, %p1322_p11 }
  0x1f   :  { %p1325_p0 = pnand %p1324_p13, %p1318_p10 }
  0x21   :  { %1328 = shalt.err (!%p1325_p0)
}
  0x22   :  { %47 = dma.hbm_to_vmem [thread:$0]  %s1495_s2, 128, %s45_s6, [#allocation6]  }
  0x23   :  { %s1337_s11 = scalar_lea.vmem %s54_s8, 2048  ;;  %p1342_p2 = scmp.lt.s32.totalorder %s54_s8, %s54_s8 }
  0x24   :  { %p1338_p1 = scmp.ne.s32.totalorder %s54_s8, %s1337_s11  ;;  %p1343_p3 = scmp.lt.s32.totalorder %s1337_s11, %s1337_s11 }
  0x26   :  { %p1344_p4 = por %p1343_p3, %p1342_p2 }
  0x28   :  { %p1345_p5 = pnand %p1344_p4, %p1338_p1 }
  0x2a   :  { %1348 = shalt.err (!%p1345_p5)
}
  0x2b   :  { %59 = dma.hbm_to_vmem [thread:$0]  %s1496_s3, 2048, %s54_s8, [#allocation9], %s1379_s23, %s1379_s23, %s1380_s24  }
  0x2c   :  { %1369 = dma.done.wait [#allocation3], 2048  }
  0x2d   :  { %1370 = vsyncadd [#allocation3], 4294965248 }
  0x2e   :  { %1371 = dma.done.wait [#allocation6], 2688  }
  0x2f   :  { %1372 = vsyncadd [#allocation6], 4294964608 }
  0x30   :  { %1373 = dma.done.wait [#allocation9], 2048  }
  0x31   :  { %1374 = vsyncadd [#allocation9], 4294965248  ;;  %v98_v0 = vld [vmem:[#allocation5 + $0x38] sm:$0xff]  ;;  %v97_v2 = vld [vmem:[#allocation5 + $0x30] sm:$0xff]  ;;  %vm99_vm0 = vcmask 261120   ;;  %v1383_v60 = vmov 0.0  }
  0x32   :  { %v85_v1 = vld [vmem:[#allocation5 + $0x18] sm:$0xff]  ;;  %1125 = vmatprep.subr.mxu0 %v98_v0  ;;  %v84_v3 = vld [vmem:[#allocation5 + $0x10] sm:$0xff]  ;;  %v96_v4 = vld [vmem:[#allocation5 + $0x28] sm:$0xff]  ;;  %vm1384_vm1 = vmmov 0   ;;  %vm904_vm2 = vcmask 1041409   ;;  %vm906_vm3 = vcmask 1042434  }
  0x33   :  { %1145 = vmatprep.subr.mxu1 %v85_v1  ;;  %1126 = vmatpush3.msra.mxu0 %v98_v0  ;;  %v83_v5 = vld [vmem:[#allocation5 + $0x8] sm:$0xff]  ;;  %v95_v6 = vld [vmem:[#allocation5 + $0x20] sm:$0xff]  ;;  %v87_v10 = vld [vmem:[#allocation2 + $0x11] sm:$0xff]  ;;  %vm908_vm4 = vcmask 1043459   ;;  %vm910_vm5 = vcmask 1044484   ;;  %vm912_vm6 = vcmask 1045509  }
  0x34   :  { %1146 = vmatpush3.msra.mxu1 %v85_v1  ;;  %1127 = vmatprep.subr.mxu0 %v97_v2  ;;  %v82_v7 = vld [vmem:[#allocation5] sm:$0xff]  ;;  %v75_v11 = vld [vmem:[#allocation2 + $0x10] sm:$0xff]  ;;  %v370_v12 = vld [vmem:[#allocation5 + $0x58] sm:$0xff]  ;;  %vm914_vm7 = vcmask 1046534   ;;  %vm916_vm8 = vcmask 1047559   ;;  %s1385_s13 = smov [#allocation10]  }
  0x35   :  { %1147 = vmatprep.subr.mxu1 %v84_v3  ;;  %1128 = vmatpush3.msra.mxu0 %v97_v2  ;;  %v86_v8 = vld [vmem:[#allocation2 + $0x1] sm:$0xff]  ;;  %v369_v15 = vld [vmem:[#allocation5 + $0x50] sm:$0xff]  ;;  %v520_v16 = vld [vmem:[#allocation5 + $0x78] sm:$0xff]  ;;  %s996_s14 = sshll.u32 %s1385_s13, 4  ;;  %s997_s14 = int_to_ptr.vmem [resolvable:$true] %s996_s14 }
  0x36   :  { %1148 = vmatpush3.msra.mxu1 %v84_v3  ;;  %1129 = vmatprep.subr.mxu0 %v96_v4  ;;  %v74_v9 = vld [vmem:[#allocation2] sm:$0xff]  ;;  %v89_v17 = vld [vmem:[#allocation2 + $0x31] sm:$0xff]  ;;  %v368_v21 = vld [vmem:[#allocation5 + $0x48] sm:$0xff]  ;;  %s1349_s15 = scalar_lea.vmem %s997_s14, 128  ;;  %p1354_p7 = scmp.lt.s32.totalorder %s997_s14, %s997_s14 }
  0x37   :  { %1149 = vmatprep.subr.mxu1 %v83_v5  ;;  %1130 = vmatpush3.msra.mxu0 %v96_v4  ;;  %v88_v13 = vld [vmem:[#allocation2 + $0x21] sm:$0xff]  ;;  %v77_v18 = vld [vmem:[#allocation2 + $0x30] sm:$0xff]  ;;  %v670_v32 = vld [vmem:[#allocation5 + $0x98] sm:$0xff]  ;;  %p1350_p6 = scmp.ne.s32.totalorder %s997_s14, %s1349_s15  ;;  %p1355_p8 = scmp.lt.s32.totalorder %s1349_s15, %s1349_s15 }
  0x38   :  { %1150 = vmatpush3.msra.mxu1 %v83_v5  ;;  %1131 = vmatprep.subr.mxu0 %v95_v6  ;;  %v76_v14 = vld [vmem:[#allocation2 + $0x20] sm:$0xff]  ;;  %v91_v22 = vld [vmem:[#allocation2 + $0x51] sm:$0xff]  ;;  %v518_v30 = vld [vmem:[#allocation5 + $0x68] sm:$0xff] }
  0x39   :  { %1151 = vmatprep.subr.mxu1 %v82_v7  ;;  %1132 = vmatpush3.msra.mxu0 %v95_v6  ;;  %v90_v19 = vld [vmem:[#allocation2 + $0x41] sm:$0xff]  ;;  %v79_v23 = vld [vmem:[#allocation2 + $0x50] sm:$0xff]  ;;  %v887_v62 = vld [vmem:[#allocation8 + $0x70] sm:$0xff]  ;;  %p1356_p9 = por %p1355_p8, %p1354_p7 }
  0x3a   :  { %1133 = vmatprep.mubr.msk.f32.mxu0 %vm99_vm0, %v86_v8  ;;  %1152 = vmatpush3.msra.mxu1 %v82_v7  ;;  %v78_v20 = vld [vmem:[#allocation2 + $0x40] sm:$0xff]  ;;  %v519_v27 = vld [vmem:[#allocation5 + $0x70] sm:$0xff]  ;;  %v668_v41 = vld [vmem:[#allocation5 + $0x88] sm:$0xff] }
  0x3b   :  { %1153 = vmatprep.mubr.msk.f32.mxu1 %vm99_vm0, %v74_v9  ;;  %1134 = vmatmul.mubr.msk.f32.vlgmr.msra.gmra.mxu0 %vm99_vm0, %v87_v10  ;;  %v92_v24 = vld [vmem:[#allocation2 + $0x61] sm:$0xff]  ;;  %v93_v28 = vld [vmem:[#allocation2 + $0x71] sm:$0xff]  ;;  %p1357_p10 = pnand %p1356_p9, %p1350_p6 }
  0x3c   :  { %1154 = vmatmul.mubr.msk.f32.vlgmr.msra.gmra.mxu1 %vm99_vm0, %v75_v11  ;;  %1165 = vmatprep.subr.mxu0 %v370_v12  ;;  %v80_v25 = vld [vmem:[#allocation2 + $0x60] sm:$0xff]  ;;  %v81_v29 = vld [vmem:[#allocation2 + $0x70] sm:$0xff]  ;;  %v885_v0 = vld [vmem:[#allocation8 + $0x60] sm:$0xff] }
  0x3d   :  { %1136 = vmatprep.mubr.msk.f32.mxu0 %vm99_vm0, %v88_v13  ;;  %1166 = vmatpush3.msra.mxu0 %v370_v12  ;;  %v367_v26 = vld [vmem:[#allocation5 + $0x40] sm:$0xff]  ;;  %v359_v35 = vld [vmem:[#allocation2 + $0x12] sm:$0xff]  ;;  %v881_v4 = vld [vmem:[#allocation8 + $0x40] sm:$0xff] }
  0x3e   :  { %1156 = vmatprep.mubr.msk.f32.mxu1 %vm99_vm0, %v76_v14  ;;  %1167 = vmatprep.subr.mxu0 %v369_v15  ;;  %v358_v31 = vld [vmem:[#allocation2 + $0x2] sm:$0xff]  ;;  %v509_v36 = vld [vmem:[#allocation2 + $0x13] sm:$0xff] }
  0x3f   :  { %1185 = vmatprep.subr.mxu1 %v520_v16  ;;  %1137 = vmatmul.mubr.msk.f32.gmra.mxu0 %vm99_vm0, %v89_v17  ;;  %v517_v33 = vld [vmem:[#allocation5 + $0x60] sm:$0xff]  ;;  %v669_v38 = vld [vmem:[#allocation5 + $0x90] sm:$0xff]  ;;  %v883_v2 = vld [vmem:[#allocation8 + $0x50] sm:$0xff] }
  0x40   :  { %1157 = vmatmul.mubr.msk.f32.gmra.mxu1 %vm99_vm0, %v77_v18  ;;  %1168 = vmatpush3.msra.mxu0 %v369_v15  ;;  %v508_v34 = vld [vmem:[#allocation2 + $0x3] sm:$0xff]  ;;  %v361_v40 = vld [vmem:[#allocation2 + $0x32] sm:$0xff] }
  0x41   :  { %1139 = vmatprep.mubr.msk.f32.mxu0 %vm99_vm0, %v90_v19  ;;  %1159 = vmatprep.mubr.msk.f32.mxu1 %vm99_vm0, %v78_v20  ;;  %v360_v37 = vld [vmem:[#allocation2 + $0x22] sm:$0xff]  ;;  %v511_v42 = vld [vmem:[#allocation2 + $0x33] sm:$0xff] }
  0x42   :  { %1169 = vmatprep.subr.mxu0 %v368_v21  ;;  %1186 = vmatpush3.msra.mxu1 %v520_v16  ;;  %v510_v39 = vld [vmem:[#allocation2 + $0x23] sm:$0xff]  ;;  %v363_v46 = vld [vmem:[#allocation2 + $0x52] sm:$0xff] }
  0x43   :  { %1170 = vmatpush3.msra.mxu0 %v368_v21  ;;  %1187 = vmatprep.subr.mxu1 %v519_v27  ;;  %v362_v43 = vld [vmem:[#allocation2 + $0x42] sm:$0xff]  ;;  %v513_v47 = vld [vmem:[#allocation2 + $0x53] sm:$0xff] }
  0x44   :  { %1140 = vmatmul.mubr.msk.f32.gmra.mxu0 %vm99_vm0, %v91_v22  ;;  %1160 = vmatmul.mubr.msk.f32.gmra.mxu1 %vm99_vm0, %v79_v23  ;;  %v512_v44 = vld [vmem:[#allocation2 + $0x43] sm:$0xff]  ;;  %v365_v50 = vld [vmem:[#allocation2 + $0x72] sm:$0xff] }
  0x45   :  { %1142 = vmatprep.mubr.msk.f32.mxu0 %vm99_vm0, %v92_v24  ;;  %1162 = vmatprep.mubr.msk.f32.mxu1 %vm99_vm0, %v80_v25  ;;  %v667_v45 = vld [vmem:[#allocation5 + $0x80] sm:$0xff]  ;;  %v515_v51 = vld [vmem:[#allocation2 + $0x73] sm:$0xff]  ;;  %v877_v8 = vld [vmem:[#allocation8 + $0x20] sm:$0xff] }
  0x46   :  { %1171 = vmatprep.subr.mxu0 %v367_v26  ;;  %1188 = vmatpush3.msra.mxu1 %v519_v27  ;;  %v364_v48 = vld [vmem:[#allocation2 + $0x62] sm:$0xff]  ;;  %v659_v53 = vld [vmem:[#allocation2 + $0x14] sm:$0xff] }
  0x47   :  { %1172 = vmatpush3.msra.mxu0 %v367_v26  ;;  %1189 = vmatprep.subr.mxu1 %v518_v30  ;;  %v514_v49 = vld [vmem:[#allocation2 + $0x63] sm:$0xff]  ;;  %v661_v55 = vld [vmem:[#allocation2 + $0x34] sm:$0xff] }
  0x48   :  { %1143 = vmatmul.mubr.msk.f32.gmra.mxu0 %vm99_vm0, %v93_v28  ;;  %1163 = vmatmul.mubr.msk.f32.gmra.mxu1 %vm99_vm0, %v81_v29  ;;  %v658_v52 = vld [vmem:[#allocation2 + $0x4] sm:$0xff]  ;;  %v663_v57 = vld [vmem:[#allocation2 + $0x54] sm:$0xff] }
  0x49   :  { %1173 = vmatprep.mubr.msk.f32.mxu0 %vm99_vm0, %v358_v31  ;;  %1190 = vmatpush3.msra.mxu1 %v518_v30  ;;  %v660_v54 = vld [vmem:[#allocation2 + $0x24] sm:$0xff]  ;;  %v665_v59 = vld [vmem:[#allocation2 + $0x74] sm:$0xff] }
  0x4a   :  { %1205 = vmatprep.subr.mxu0 %v670_v32  ;;  %1191 = vmatprep.subr.mxu1 %v517_v33  ;;  %v662_v56 = vld [vmem:[#allocation2 + $0x44] sm:$0xff]  ;;  %v886_v63 = vld [vmem:[#allocation8 + $0x68] sm:$0xff]  ;;  %v879_v6 = vld [vmem:[#allocation8 + $0x30] sm:$0xff] }
  0x4b   :  { %1193 = vmatprep.mubr.msk.f32.mxu1 %vm99_vm0, %v508_v34  ;;  %1192 = vmatpush3.msra.mxu1 %v517_v33  ;;  %v664_v58 = vld [vmem:[#allocation2 + $0x64] sm:$0xff]  ;;  %v882_v3 = vld [vmem:[#allocation8 + $0x48] sm:$0xff]  ;;  %v875_v10 = vld [vmem:[#allocation8 + $0x10] sm:$0xff] }
  0x4c   :  { %1174 = vmatmul.mubr.msk.f32.vlgmr.msra.gmra.mxu0 %vm99_vm0, %v359_v35  ;;  %1194 = vmatmul.mubr.msk.f32.vlgmr.msra.gmra.mxu1 %vm99_vm0, %v509_v36  ;;  %v888_v61 = vld [vmem:[#allocation8 + $0x78] sm:$0xff]  ;;  %v878_v7 = vld [vmem:[#allocation8 + $0x28] sm:$0xff]  ;;  %v873_v12 = vld [vmem:[#allocation8] sm:$0xff] }
  0x4d   :  { %1206 = vmatpush3.msra.mxu0 %v670_v32  ;;  %1176 = vmatprep.mubr.msk.f32.mxu0 %vm99_vm0, %v360_v37  ;;  %v884_v1 = vld [vmem:[#allocation8 + $0x58] sm:$0xff]  ;;  %v874_v11 = vld [vmem:[#allocation8 + $0x8] sm:$0xff] }
  0x4e   :  { %1207 = vmatprep.subr.mxu0 %v669_v38  ;;  %1196 = vmatprep.mubr.msk.f32.mxu1 %vm99_vm0, %v510_v39  ;;  %v880_v5 = vld [vmem:[#allocation8 + $0x38] sm:$0xff] }
  0x4f   :  { %1208 = vmatpush3.msra.mxu0 %v669_v38  ;;  %1225 = vmatprep.subr.mxu1 %v1383_v60  ;;  %v876_v9 = vld [vmem:[#allocation8 + $0x18] sm:$0xff] }
  0x50   :  { %1177 = vmatmul.mubr.msk.f32.gmra.mxu0 %vm99_vm0, %v361_v40  ;;  %1209 = vmatprep.subr.mxu0 %v668_v41 }
  0x51   :  { %1197 = vmatmul.mubr.msk.f32.gmra.mxu1 %vm99_vm0, %v511_v42  ;;  %1179 = vmatprep.mubr.msk.f32.mxu0 %vm99_vm0, %v362_v43 }
  0x52   :  { %1199 = vmatprep.mubr.msk.f32.mxu1 %vm99_vm0, %v512_v44  ;;  %1210 = vmatpush3.msra.mxu0 %v668_v41 }
  0x53   :  { %1211 = vmatprep.subr.mxu0 %v667_v45  ;;  %1226 = vmatpush3.msra.mxu1 %v888_v61 }
  0x54   :  { %1180 = vmatmul.mubr.msk.f32.gmra.mxu0 %vm99_vm0, %v363_v46  ;;  %1227 = vmatprep.subr.mxu1 %v1383_v60 }
  0x55   :  { %1200 = vmatmul.mubr.msk.f32.gmra.mxu1 %vm99_vm0, %v513_v47  ;;  %1182 = vmatprep.mubr.msk.f32.mxu0 %vm99_vm0, %v364_v48 }
  0x56   :  { %1202 = vmatprep.mubr.msk.f32.mxu1 %vm99_vm0, %v514_v49  ;;  %1212 = vmatpush3.msra.mxu0 %v667_v45 }
  0x57   :  { %1228 = vmatpush3.msra.mxu1 %v887_v62 }
  0x58   :  { %1183 = vmatmul.mubr.msk.f32.gmra.mxu0 %vm99_vm0, %v365_v50  ;;  %1229 = vmatprep.subr.mxu1 %v1383_v60 }
  0x59   :  { %1203 = vmatmul.mubr.msk.f32.gmra.mxu1 %vm99_vm0, %v515_v51  ;;  %1213 = vmatprep.mubr.msk.f32.mxu0 %vm99_vm0, %v658_v52  ;;  %v1477_v51 = vld [vmem:[#allocation7] sm:$0xff] }
  0x5a   :  { %1230 = vmatpush3.msra.mxu1 %v886_v63  ;;  %1257 = vmatprep.mubr.msk.f32.mxu1 %vm1384_vm1, %v1383_v60 }
  0x5b   :  { %1231 = vmatprep.subr.mxu1 %v1383_v60 }
  0x5c   :  { %1214 = vmatmul.mubr.msk.f32.vlgmr.msra.gmra.mxu0 %vm99_vm0, %v659_v53  ;;  %1232 = vmatpush3.msra.mxu1 %v885_v0 }
  0x5d   :  { %1216 = vmatprep.mubr.msk.f32.mxu0 %vm99_vm0, %v660_v54  ;;  %1233 = vmatprep.subr.mxu1 %v1383_v60 }
  0x5e   :  { %1234 = vmatpush3.msra.mxu1 %v884_v1 }
  0x5f   :  { %1235 = vmatprep.subr.mxu1 %v1383_v60 }
  0x60   :  { %1217 = vmatmul.mubr.msk.f32.gmra.mxu0 %vm99_vm0, %v661_v55  ;;  %1236 = vmatpush3.msra.mxu1 %v883_v2 }
  0x61   :  { %1219 = vmatprep.mubr.msk.f32.mxu0 %vm99_vm0, %v662_v56  ;;  %1237 = vmatprep.subr.mxu1 %v1383_v60 }
  0x62   :  { %1238 = vmatpush3.msra.mxu1 %v882_v3 }
  0x63   :  { %1239 = vmatprep.subr.mxu1 %v1383_v60 }
  0x64   :  { %1220 = vmatmul.mubr.msk.f32.gmra.mxu0 %vm99_vm0, %v663_v57  ;;  %1240 = vmatpush3.msra.mxu1 %v881_v4 }
  0x65   :  { %1222 = vmatprep.mubr.msk.f32.mxu0 %vm99_vm0, %v664_v58  ;;  %1241 = vmatprep.subr.mxu1 %v1383_v60 }
  0x66   :  { %1242 = vmatpush3.msra.mxu1 %v880_v5 }
  0x67   :  { %1243 = vmatprep.subr.mxu1 %v1383_v60 }
  0x68   :  { %1223 = vmatmul.mubr.msk.f32.gmra.mxu0 %vm99_vm0, %v665_v59  ;;  %1244 = vmatpush3.msra.mxu1 %v879_v6 }
  0x69   :  { %1245 = vmatprep.subr.mxu1 %v1383_v60 }
  0x6a   :  { %1246 = vmatpush3.msra.mxu1 %v878_v7 }
  0x6b   :  { %1247 = vmatprep.subr.mxu1 %v1383_v60 }
  0x6c   :  { %1248 = vmatpush3.msra.mxu1 %v877_v8 }
  0x6d   :  { %1249 = vmatprep.subr.mxu1 %v1383_v60 }
  0x6e   :  { %1250 = vmatpush3.msra.mxu1 %v876_v9 }
  0x6f   :  { %1251 = vmatprep.subr.mxu1 %v1383_v60 }
  0x70   :  { %1252 = vmatpush3.msra.mxu1 %v875_v10 }
  0x71   :  { %1253 = vmatprep.subr.mxu1 %v1383_v60 }
  0x72   :  { %1254 = vmatpush3.msra.mxu1 %v874_v11 }
  0x73   :  { %1255 = vmatprep.subr.mxu1 %v1383_v60 }
  0x74   :  { %1256 = vmatpush3.msra.mxu1 %v873_v12 }
  0xfb   :  { %v1135_v13 = vpop.f32.mrf.mxu0 }
  0xfc   :  { %v1155_v14 = vpop.f32.mrf.mxu1 }
  0xfd   :  { %v190_v15 = vpop.f32.mrf.mxu0  ;;  %v325_v37 = vadd.f32 %v1155_v14, %v1135_v13 }
  0xfe   :  { %v319_v16 = vpop.f32.mrf.mxu1 }
  0xff   :  { %v1138_v17 = vpop.f32.mrf.mxu0  ;;  %v320_v39 = vadd.f32 %v319_v16, %v190_v15 }
 0x100   :  { %v1158_v18 = vpop.f32.mrf.mxu1 }
 0x101   :  { %v200_v19 = vpop.f32.mrf.mxu0  ;;  %v335_v43 = vadd.f32 %v1158_v18, %v1138_v17 }
 0x102   :  { %v329_v20 = vpop.f32.mrf.mxu1 }
 0x103   :  { %v330_v46 = vadd.f32 %v329_v20, %v200_v19 }
 0x104   :  { %v1141_v21 = vpop.f32.mrf.mxu0  ;;  %v1161_v22 = vpop.f32.mrf.mxu1 }
 0x105   :  { %v345_v55 = vadd.f32 %v1161_v22, %v1141_v21 }
 0x106   :  { %v210_v23 = vpop.f32.mrf.mxu0  ;;  %v339_v24 = vpop.f32.mrf.mxu1 }
 0x107   :  { %v340_v61 = vadd.f32 %v339_v24, %v210_v23 }
 0x108   :  { %v1144_v25 = vpop.f32.mrf.mxu0  ;;  %v1164_v26 = vpop.f32.mrf.mxu1 }
 0x109   :  { %v355_v4 = vadd.f32 %v1164_v26, %v1144_v25 }
 0x10a   :  { %v220_v27 = vpop.f32.mrf.mxu0  ;;  %v349_v28 = vpop.f32.mrf.mxu1 }
 0x10b   :  { %v350_v12 = vadd.f32 %v349_v28, %v220_v27 }
 0x10c   :  { %v1175_v29 = vpop.f32.mrf.mxu0  ;;  %v1195_v30 = vpop.f32.mrf.mxu1 }
 0x10d   :  { %v501_v40 = vadd.f32 %v1175_v29, %v325_v37 }
 0x10e   :  { %v461_v31 = vpop.f32.mrf.mxu0  ;;  %v611_v32 = vpop.f32.mrf.mxu1 }
 0x10f   :  { %v500_v44 = vadd.f32 %v461_v31, %v320_v39  ;;  %v651_v47 = vadd.f32 %v1195_v30, %v501_v40 }
 0x110   :  { %v1178_v33 = vpop.f32.mrf.mxu0 }
 0x111   :  { %v1198_v35 = vpop.f32.mrf.mxu1  ;;  %v503_v48 = vadd.f32 %v1178_v33, %v335_v43  ;;  %v650_v52 = vadd.f32 %v611_v32, %v500_v44 }
 0x112   :  { %v471_v34 = vpop.f32.mrf.mxu0 }
 0x113   :  { %v621_v41 = vpop.f32.mrf.mxu1  ;;  %v502_v53 = vadd.f32 %v471_v34, %v330_v46  ;;  %v653_v57 = vadd.f32 %v1198_v35, %v503_v48 }
 0x114   :  { %v1181_v36 = vpop.f32.mrf.mxu0 }
 0x115   :  { %v1201_v49 = vpop.f32.mrf.mxu1  ;;  %v505_v62 = vadd.f32 %v1181_v36, %v345_v55  ;;  %v652_v0 = vadd.f32 %v621_v41, %v502_v53 }
 0x116   :  { %v481_v38 = vpop.f32.mrf.mxu0 }
 0x117   :  { %v631_v58 = vpop.f32.mrf.mxu1  ;;  %v504_v5 = vadd.f32 %v481_v38, %v340_v61  ;;  %v655_v13 = vadd.f32 %v1201_v49, %v505_v62 }
 0x118   :  { %v1184_v42 = vpop.f32.mrf.mxu0 }
 0x119   :  { %v1204_v7 = vpop.f32.mrf.mxu1  ;;  %v507_v14 = vadd.f32 %v1184_v42, %v355_v4  ;;  %v654_v20 = vadd.f32 %v631_v58, %v504_v5 }
 0x11a   :  { %v491_v45 = vpop.f32.mrf.mxu0 }
 0x11b   :  { %v506_v21 = vadd.f32 %v491_v45, %v350_v12  ;;  %v641_v24 = vpop.f32.mrf.mxu1  ;;  %v657_v31 = vadd.f32 %v1204_v7, %v507_v14 }
 0x11c   :  { %v1215_v50 = vpop.f32.mrf.mxu0 }
 0x11d   :  { %v801_v54 = vadd.f32 %v1215_v50, %v651_v47  ;;  %v656_v36 = vadd.f32 %v641_v24, %v506_v21 }
 0x11e   :  { %v761_v56 = vpop.f32.mrf.mxu0 }
 0x11f   :  { %v810_v59 = vadd.f32 %v1477_v51, %v801_v54  ;;  %v800_v60 = vadd.f32 %v761_v56, %v650_v52 }
 0x120   :  { %v1218_v63 = vpop.f32.mrf.mxu0 }
 0x121   :  { %v818_v1 = vmax.f32 %v810_v59, 0.0  ;;  %v809_v2 = vadd.f32 %v1477_v51, %v800_v60  ;;  %v803_v3 = vadd.f32 %v1218_v63, %v653_v57 }
 0x122   :  { %v771_v6 = vpop.f32.mrf.mxu0 }
 0x123   :  { %v831_v8 = vrot.slane %v818_v1, 4  ;;  %v817_v9 = vmax.f32 %v809_v2, 0.0  ;;  %v812_v10 = vadd.f32 %v1477_v51, %v803_v3  ;;  %v802_v11 = vadd.f32 %v771_v6, %v652_v0 }
 0x124   :  { %v1221_v15 = vpop.f32.mrf.mxu0 }
 0x125   :  { %v832_v16 = vmax.f32 %v818_v1, %v831_v8  ;;  %v825_v17 = vrot.slane %v817_v9, 4  ;;  %v820_v18 = vmax.f32 %v812_v10, 0.0  ;;  %v811_v19 = vadd.f32 %v1477_v51, %v802_v11 }
 0x126   :  { %v805_v22 = vadd.f32 %v1221_v15, %v655_v13  ;;  %v781_v23 = vpop.f32.mrf.mxu0 }
 0x127   :  { %v833_v25 = vrot.slane %v832_v16, 2  ;;  %v826_v26 = vmax.f32 %v817_v9, %v825_v17  ;;  %v843_v29 = vrot.slane %v820_v18, 4  ;;  %v819_v30 = vmax.f32 %v811_v19, 0.0 }
 0x128   :  { %v814_v27 = vadd.f32 %v1477_v51, %v805_v22  ;;  %v804_v28 = vadd.f32 %v781_v23, %v654_v20  ;;  %v1224_v32 = vpop.f32.mrf.mxu0 }
 0x129   :  { %v827_v33 = vrot.slane %v826_v26, 2  ;;  %v844_v34 = vmax.f32 %v820_v18, %v843_v29  ;;  %v837_v35 = vrot.slane %v819_v30, 4  ;;  %v807_v39 = vadd.f32 %v1224_v32, %v657_v31  ;;  %v1047_v31 = vld [vmem:[%s1497_s4] ss:$0 sm:$0xff] }
 0x12a   :  { %v822_v37 = vmax.f32 %v814_v27, 0.0  ;;  %v813_v38 = vadd.f32 %v1477_v51, %v804_v28  ;;  %v791_v40 = vpop.f32.mrf.mxu0  ;;  %v834_v41 = vmax.f32 %v832_v16, %v833_v25 }
 0x12b   :  { %v828_v42 = vmax.f32 %v826_v26, %v827_v33  ;;  %v845_v43 = vrot.slane %v844_v34, 2  ;;  %v838_v44 = vmax.f32 %v819_v30, %v837_v35  ;;  %v816_v47 = vadd.f32 %v1477_v51, %v807_v39 }
 0x12c   :  { %v855_v45 = vrot.slane %v822_v37, 4  ;;  %v821_v46 = vmax.f32 %v813_v38, 0.0  ;;  %v806_v48 = vadd.f32 %v791_v40, %v656_v36  ;;  %v835_v56 = vrot.slane %v834_v41, 1 }
 0x12d   :  { %v829_v49 = vrot.slane %v828_v42, 1  ;;  %v839_v50 = vrot.slane %v838_v44, 2  ;;  %v824_v54 = vmax.f32 %v816_v47, 0.0  ;;  %v846_v57 = vmax.f32 %v844_v34, %v845_v43 }
 0x12e   :  { %v856_v52 = vmax.f32 %v822_v37, %v855_v45  ;;  %v849_v53 = vrot.slane %v821_v46, 4  ;;  %v815_v55 = vadd.f32 %v1477_v51, %v806_v48  ;;  %v836_v4 = vmax.f32 %v834_v41, %v835_v56 }
 0x12f   :  { %v840_v58 = vmax.f32 %v838_v44, %v839_v50  ;;  %v867_v61 = vrot.slane %v824_v54, 4  ;;  %v830_v63 = vmax.f32 %v828_v42, %v829_v49  ;;  %v847_v5 = vrot.slane %v846_v57, 1 }
 0x130   :  { %v857_v59 = vrot.slane %v856_v52, 2  ;;  %v850_v60 = vmax.f32 %v821_v46, %v849_v53  ;;  %v823_v62 = vmax.f32 %v815_v55, 0.0 }
 0x131   :  { %v841_v0 = vrot.slane %v840_v58, 1  ;;  %v868_v2 = vmax.f32 %v824_v54, %v867_v61  ;;  %v905_v10 = vsel %vm904_vm2, %v836_v4, %v830_v63  ;;  %v848_v15 = vmax.f32 %v846_v57, %v847_v5 }
 0x132   :  { %v851_v1 = vrot.slane %v850_v60, 2  ;;  %v861_v3 = vrot.slane %v823_v62, 4  ;;  %v858_v7 = vmax.f32 %v856_v52, %v857_v59 }
 0x133   :  { %v842_v6 = vmax.f32 %v840_v58, %v841_v0  ;;  %v869_v51 = vrot.slane %v868_v2, 2 }
 0x134   :  { %v852_v8 = vmax.f32 %v850_v60, %v851_v1  ;;  %v862_v9 = vmax.f32 %v823_v62, %v861_v3  ;;  %v859_v16 = vrot.slane %v858_v7, 1 }
 0x135   :  { %v907_v11 = vsel %vm906_vm3, %v842_v6, %v905_v10  ;;  %v870_v13 = vmax.f32 %v868_v2, %v869_v51 }
 0x136   :  { %v853_v12 = vrot.slane %v852_v8, 1  ;;  %v863_v14 = vrot.slane %v862_v9, 2  ;;  %v909_v20 = vsel %vm908_vm4, %v848_v15, %v907_v11  ;;  %v860_v23 = vmax.f32 %v858_v7, %v859_v16 }
 0x137   :  { %v871_v19 = vrot.slane %v870_v13, 1 }
 0x138   :  { %v854_v17 = vmax.f32 %v852_v8, %v853_v12  ;;  %v864_v18 = vmax.f32 %v862_v9, %v863_v14 }
 0x139   :  { %v872_v25 = vmax.f32 %v870_v13, %v871_v19 }
 0x13a   :  { %v865_v21 = vrot.slane %v864_v18, 1  ;;  %v911_v22 = vsel %vm910_vm5, %v854_v17, %v909_v20 }
 0x13b   :  { %v913_v26 = vsel %vm912_vm6, %v860_v23, %v911_v22 }
 0x13c   :  { %v866_v24 = vmax.f32 %v864_v18, %v865_v21 }
 0x13e   :  { %v915_v29 = vsel %vm914_vm7, %v866_v24, %v913_v26 }
 0x13f   :  { %v917_v30 = vsel %vm916_vm8, %v872_v25, %v915_v29 }
 0x140   :  { %1258 = vmatmul.mubr.f32.vlgmr.msra.gmra.mxu1 %v917_v30 }
 0x200   :  { %v985_v27 = vpop.f32.mrf.mxu1 }
 0x201   :  { %v986_v28 = vadd.f32 %v1047_v31, %v985_v27 }
 0x202   :  { %v1259_v32 = vpop.f32.mrf.mxu1 }
 0x203   :  { %989 = vst [vmem:[#allocation10] sm:$0xff] %v986_v28 }
 0x204   :  { %1360 = shalt.err (!%p1357_p10)
}
 0x205   :  { %999 = dma.vmem_to_hbm [thread:$0]  %s997_s14, 128, %s1498_s5, [#allocation4]  }
 0x206   :  { %1375 = dma.done.wait [#allocation4], 128  }
 0x207   :  { %1376 = vsyncadd [#allocation4], 4294967168 }
 0x208   :  { %1003 = vsyncpa [#allocation3], 1 }
 0x209   :  { %1004 = vsyncpa [#allocation6], 1 }
 0x20a   :  { %1005 = vsyncpa [#allocation9], 1 }
 0x20b   :  { %1006 = vsyncpa [#allocation4], 1 }

</bundles_post_ra>
